<compile_context>
chip_gen: v5e
topology: v5e:2x2
jax: 0.10.0
libtpu: 0.0.40
codegen_flags: <defaults>
</compile_context>

<pallas_src>
import jax
import jax.numpy as jnp
from jax import lax
from jax.experimental import pallas as pl
from jax.experimental.pallas import tpu as pltpu


def _round_up(v, m):
    return ((v + m - 1) // m) * m


def _pick_tile(dim, preferred, align):
    """Largest legal block size <= preferred for this dim (full dim always legal)."""
    if dim <= preferred:
        return dim
    return max(align, (preferred // align) * align)


def _linear_kernel(x_ref, w_ref, b_ref, o_ref, acc_ref):
    # x_ref: (tm, tk)   w_ref: (tn, tk) (PyTorch (out, in) layout — no transpose)
    # b_ref: (1, tn)    o_ref: (tm, tn) acc_ref: (tm, tn) f32 scratch
    k = pl.program_id(2)

    @pl.when(k == 0)
    def _init():
        acc_ref[...] = jnp.zeros_like(acc_ref)

    # x @ w.T : contract the K axis of both operands, accumulate in f32 on MXU.
    acc_ref[...] += lax.dot_general(
        x_ref[...], w_ref[...],
        dimension_numbers=(((1,), (1,)), ((), ())),
        preferred_element_type=jnp.float32)

    @pl.when(k == pl.num_programs(2) - 1)
    def _finalize():
        o_ref[...] = (acc_ref[...] + b_ref[...].astype(jnp.float32)).astype(o_ref.dtype)


def regression_forward(x, weight, bias, *, tile_m=256, tile_n=256, tile_k=512,
                       min_pallas_flops=1 << 19):
    """y = x @ weight.T + bias, matching torch.nn.Linear.

    x:      (M, K) float32
    weight: (N, K) float32  (PyTorch out_features x in_features layout, used as-is)
    bias:   (N,)   float32
    returns (M, N) float32
    """
    M, K = x.shape
    N, K2 = weight.shape
    assert K == K2, "in_features mismatch"
    assert bias.shape == (N,)

    # Toy-sized problems: pallas_call launch + DMA setup dwarfs the matmul.
    if 2 * M * N * K < min_pallas_flops:
        return x @ weight.T + bias

    tm = _pick_tile(M, tile_m, 8)      # sublane-aligned M tile
    tn = _pick_tile(N, tile_n, 128)    # lane-dense N tile
    tk = _pick_tile(K, tile_k, 128)    # K reduction tile

    # Zero-pad K (only if needed) so every reduction block is fully valid.
    Kp = _round_up(K, tk)
    if Kp != K:
        x = jnp.pad(x, ((0, 0), (0, Kp - K)))
        weight = jnp.pad(weight, ((0, 0), (0, Kp - K)))

    b2d = bias.reshape(1, N)

    grid = (pl.cdiv(M, tm), pl.cdiv(N, tn), Kp // tk)

    cost = pl.CostEstimate(
        flops=2 * M * N * K,
        transcendentals=0,
        bytes_accessed=4 * (M * K + N * K + M * N + N))

    return pl.pallas_call(
        _linear_kernel,
        out_shape=jax.ShapeDtypeStruct((M, N), x.dtype),
        grid_spec=pltpu.PrefetchScalarGridSpec(
            num_scalar_prefetch=0,
            grid=grid,
            in_specs=[
                pl.BlockSpec((tm, tk), lambda i, j, k: (i, k)),   # x tile
                pl.BlockSpec((tn, tk), lambda i, j, k: (j, k)),   # weight tile (N, K)
                pl.BlockSpec((1, tn), lambda i, j, k: (0, j)),    # bias tile
            ],
            out_specs=pl.BlockSpec((tm, tn), lambda i, j, k: (i, j)),
            scratch_shapes=[pltpu.VMEM((tm, tn), jnp.float32)],
        ),
        compiler_params=pltpu.CompilerParams(
            dimension_semantics=("parallel", "parallel", "arbitrary")),
        cost_estimate=cost,
    )(x, weight, b2d)


if __name__ == "__main__":
    key = jax.random.PRNGKey(0)
    k1, k2, k3, k4, k5, k6 = jax.random.split(key, 6)

    def init_linear(kw, kb, input_size, output_size):
        # Synthetic params mimicking nn.Linear's uniform(-1/sqrt(in), 1/sqrt(in)) init.
        bound = 1.0 / (input_size ** 0.5)
        w = jax.random.uniform(kw, (output_size, input_size), jnp.float32,
                               minval=-bound, maxval=bound)
        b = jax.random.uniform(kb, (output_size,), jnp.float32,
                               minval=-bound, maxval=bound)
        return w, b

    # 1) Module-sized toy shape (batch=8, input=32, output=16): XLA fallback path.
    x0 = jax.random.normal(k1, (8, 32), dtype=jnp.float32)
    w0, b0 = init_linear(k2, k3, 32, 16)
    y0 = jax.block_until_ready(regression_forward(x0, w0, b0))
    assert y0.shape == (8, 16)
    assert jnp.allclose(y0, x0 @ w0.T + b0, atol=1e-5, rtol=1e-5)

    # 2) Shape large enough to exercise the tiled Pallas kernel: multi-step
    #    M/N/K grid, partial M/N boundary blocks, and zero-padded K (440 -> 512).
    M, K, N = 320, 440, 320
    x1 = jax.random.normal(k4, (M, K), dtype=jnp.float32)
    w1, b1 = init_linear(k5, k6, K, N)
    y1 = jax.block_until_ready(
        regression_forward(x1, w1, b1, tile_m=128, tile_n=128, tile_k=128))
    assert y1.shape == (M, N)
    assert jnp.allclose(y1, x1 @ w1.T + b1, atol=1e-4, rtol=1e-4)

    print("KERNEL_OK")
</pallas_src>

<mosaic_0001>
module attributes {stable_mosaic.version = 11 : i64} {
  func.func @_linear_kernel(%arg0: i32, %arg1: i32, %arg2: i32, %arg3: memref<128x128xf32, #tpu.memory_space<vmem>>, %arg4: memref<128x128xf32, #tpu.memory_space<vmem>>, %arg5: memref<1x128xf32, #tpu.memory_space<vmem>>, %arg6: memref<128x128xf32, #tpu.memory_space<vmem>>, %arg7: memref<128x128xf32, #tpu.memory_space<vmem>>) attributes {dimension_semantics = [#tpu.dimension_semantics<parallel>, #tpu.dimension_semantics<parallel>, #tpu.dimension_semantics<arbitrary>], iteration_bounds = array<i64: 3, 3, 4>, scalar_prefetch = 0 : i64, scratch_operands = 1 : i64, tpu.core_type = #tpu.core_type<tc>, window_params = [{transform_indices = @transform_0, window_bounds = array<i64: 128, 128>}, {transform_indices = @transform_1, window_bounds = array<i64: 128, 128>}, {transform_indices = @transform_2, window_bounds = array<i64: 1, 128>}, {transform_indices = @transform_3, window_bounds = array<i64: 128, 128>}]} {
    %c0_i32 = arith.constant 0 : i32
    %0 = arith.cmpi eq, %arg2, %c0_i32 : i32
    %1 = arith.extui %0 : i1 to i32
    %c0_i32_0 = arith.constant 0 : i32
    %2 = arith.cmpi ne, %1, %c0_i32_0 : i32
    scf.if %2 {
      %cst_9 = arith.constant 0.000000e+00 : f32
      %12 = vector.broadcast %cst_9 : f32 to vector<128x128xf32>
      %c0_10 = arith.constant 0 : index
      %c0_11 = arith.constant 0 : index
      %13 = vector.load %arg7[%c0_10, %c0_11] : memref<128x128xf32, #tpu.memory_space<vmem>>, vector<128x128xf32>
      tpu.vector_store %arg7[%c0_10, %c0_11], %12 {strides = array<i32>} : memref<128x128xf32, #tpu.memory_space<vmem>>, vector<128x128xf32>,
    } else {
    }
    %c0 = arith.constant 0 : index
    %c0_1 = arith.constant 0 : index
    %3 = vector.load %arg7[%c0, %c0_1] : memref<128x128xf32, #tpu.memory_space<vmem>>, vector<128x128xf32>
    %c0_2 = arith.constant 0 : index
    %c0_3 = arith.constant 0 : index
    %4 = vector.load %arg3[%c0_2, %c0_3] : memref<128x128xf32, #tpu.memory_space<vmem>>, vector<128x128xf32>
    %c0_4 = arith.constant 0 : index
    %c0_5 = arith.constant 0 : index
    %5 = vector.load %arg4[%c0_4, %c0_5] : memref<128x128xf32, #tpu.memory_space<vmem>>, vector<128x128xf32>
    %cst = arith.constant dense<0.000000e+00> : vector<128x128xf32>
    %6 = tpu.matmul %4, %5, %cst {dimension_numbers = #tpu.dot_dimension_numbers<[1], [1], [0], [0], [0, 0, 1, 0], [], []>} : vector<128x128xf32>, vector<128x128xf32>, vector<128x128xf32> -> vector<128x128xf32>
    %7 = arith.addf %3, %6 : vector<128x128xf32>
    %c0_6 = arith.constant 0 : index
    %c0_7 = arith.constant 0 : index
    %8 = vector.load %arg7[%c0_6, %c0_7] : memref<128x128xf32, #tpu.memory_space<vmem>>, vector<128x128xf32>
    tpu.vector_store %arg7[%c0_6, %c0_7], %7 {strides = array<i32>} : memref<128x128xf32, #tpu.memory_space<vmem>>, vector<128x128xf32>,
    %c3_i32 = arith.constant 3 : i32
    %9 = arith.cmpi eq, %arg2, %c3_i32 : i32
    %10 = arith.extui %9 : i1 to i32
    %c0_i32_8 = arith.constant 0 : i32
    %11 = arith.cmpi ne, %10, %c0_i32_8 : i32
    scf.if %11 {
      %c0_9 = arith.constant 0 : index
      %c0_10 = arith.constant 0 : index
      %12 = vector.load %arg7[%c0_9, %c0_10] : memref<128x128xf32, #tpu.memory_space<vmem>>, vector<128x128xf32>
      %c0_11 = arith.constant 0 : index
      %c0_12 = arith.constant 0 : index
      %13 = vector.load %arg5[%c0_11, %c0_12] : memref<1x128xf32, #tpu.memory_space<vmem>>, vector<1x128xf32>
      %14 = vector.broadcast %13 : vector<1x128xf32> to vector<128x128xf32>
      %15 = arith.addf %12, %14 : vector<128x128xf32>
      %c0_13 = arith.constant 0 : index
      %c0_14 = arith.constant 0 : index
      %16 = vector.load %arg6[%c0_13, %c0_14] : memref<128x128xf32, #tpu.memory_space<vmem>>, vector<128x128xf32>
      tpu.vector_store %arg6[%c0_13, %c0_14], %15 {strides = array<i32>} : memref<128x128xf32, #tpu.memory_space<vmem>>, vector<128x128xf32>,
    } else {
    }
    return
  }
  func.func @transform_0(%arg0: i32, %arg1: i32, %arg2: i32) -> (i32, i32) {
    %c0_i32 = arith.constant 0 : i32
    return %arg0, %arg2 : i32, i32
  }
  func.func @transform_1(%arg0: i32, %arg1: i32, %arg2: i32) -> (i32, i32) {
    %c0_i32 = arith.constant 0 : i32
    return %arg1, %arg2 : i32, i32
  }
  func.func @transform_2(%arg0: i32, %arg1: i32, %arg2: i32) -> (i32, i32) {
    %c0_i32 = arith.constant 0 : i32
    %c0_i32_0 = arith.constant 0 : i32
    return %c0_i32, %arg1 : i32, i32
  }
  func.func @transform_3(%arg0: i32, %arg1: i32, %arg2: i32) -> (i32, i32) {
    %c0_i32 = arith.constant 0 : i32
    return %arg0, %arg1 : i32, i32
  }
}

</mosaic_0001>

<bundles_post_ra>
// kernel: tpu_custom_call.1
= control target key start
LH: loop header
LB: loop body
LE: loop exit
PB: predicated region body
PF: predicated region fallthrough
CT: control target
= control target key end

     0   :  { %s1758_s0 = inlined_call_operand.hbm [shape: f32[320,512], index: 0, kind: input, shape index: {}]   ;;  %s1759_s1 = inlined_call_operand.hbm [shape: f32[320,512], index: 1, kind: input, shape index: {}]   ;;  %s1760_s2 = inlined_call_operand.hbm [shape: f32[1,320], index: 2, kind: input, shape index: {}]   ;;  %s1761_s3 = inlined_call_operand.hbm [shape: f32[320,320], index: 3, kind: output, shape index: {}]  }
   0x1   :  { %1781 = sst [smem:[#allocation34_spill]] %s1761_s3 }
   0x2   :  { %8 = vsyncpa [#allocation4], 0 }
   0x3   :  { %10 = vsyncpa [#allocation4 + $0x1], 0 }
   0x4   :  { %11 = vsyncpa [#allocation7], 0 }
   0x5   :  { %13 = vsyncpa [#allocation7 + $0x1], 0 }
   0x6   :  { %14 = vsyncpa [#allocation5], 0 }
   0x7   :  { %16 = vsyncpa [#allocation5 + $0x1], 0  ;;  %s1310_s12 = smov 0   ;;  %s1312_s13 = smov 0  }
   0x8   :  { %s1314_s14 = smov 0   ;;  %s1316_s15 = smov 0  }
   0x9   :  { %s1318_s16 = smov 0   ;;  %s1320_s17 = smov 0  }
   0xa   :  { %s1322_s18 = smov 0   ;;  %s1324_s19 = smov 0  }
   0xb   :  { %s1326_s20 = smov 0   ;;  %s1328_s21 = smov 0  }
   0xc   :  { %s1330_s22 = smov 0   ;;  %s1332_s23 = smov 0  }
   0xd   :  { %s1334_s24 = smov 0   ;;  %s1336_s25 = smov 0  }
   0xe   :  { %s1338_s26 = smov 0   ;;  %s1340_s27 = smov 0  }
   0xf   :  { %s1342_s28 = smov 0   ;;  %s1344_s29 = smov 0  }
  0x10   :  { %s1346_s30 = smov 0  }
  0x11 LB: > { %1782 = sst [smem:[#allocation14_spill]] %s1203_s12  ;;  %s1404_s4 = sadd.s32 4294967295, %s1275_s30   ;;  %s1275_s30 = sphi %s1346_s30, %s22_s30   ;;  %s1271_s29 = sphi %s1344_s29, %s1842_s29   ;;  %s1267_s28 = sphi %s1342_s28, %s1854_s28   ;;  %s1263_s27 = sphi %s1340_s27, %s1853_s27   ;;  %s1259_s26 = sphi %s1338_s26, %s1839_s26   ;;  %s1255_s25 = sphi %s1336_s25, %s1852_s25   ;;  %s1251_s24 = sphi %s1334_s24, %s1851_s24   ;;  %s1247_s23 = sphi %s1332_s23, %s1850_s23   ;;  %s1243_s22 = sphi %s1330_s22, %s1849_s22   ;;  %s1239_s21 = sphi %s1328_s21, %s1848_s21   ;;  %s1235_s20 = sphi %s1326_s20, %s1847_s20   ;;  %s1231_s19 = sphi %s1324_s19, %s1846_s19   ;;  %s1227_s18 = sphi %s1322_s18, %s1845_s18   ;;  %s1223_s17 = sphi %s1320_s17, %s1844_s17   ;;  %s1219_s16 = sphi %s1318_s16, %s1843_s16   ;;  %s1215_s15 = sphi %s1316_s15, %s1834_s15   ;;  %s1211_s14 = sphi %s1314_s14, %s1833_s14   ;;  %s1207_s13 = sphi %s1312_s13, %s1832_s13   ;;  %s1203_s12 = sphi %s1310_s12, %s1831_s12  }
  0x12   : > { %1783 = sst [smem:[#allocation15_spill]] %s1207_s13  ;;  %s34_s6 = sadd.s32 1, %s1263_s27 }
  0x13   : > { %1784 = sst [smem:[#allocation16_spill]] %s1211_s14  ;;  %s37_s7 = sadd.s32 1, %s1267_s28 }
  0x14   : > { %1785 = sst [smem:[#allocation17_spill]] %s1219_s16  ;;  %p35_p0 = scmp.ge.s32.totalorder %s34_s6, 4 }
  0x15   : > { %1786 = sst [smem:[#allocation18_spill]] %s1247_s23  ;;  %s41_s8 = sadd.s32 1, %s1271_s29 }
  0x16   : > { %1787 = sst [smem:[#allocation19_spill]] %s1251_s24  ;;  %s50_s9 = sadd.s32 1, %s1247_s23 }
  0x17   : > { %1788 = sst [smem:[#allocation20_spill]] %s1255_s25  ;;  %p57_p1 = scmp.ne.s32.totalorder %s1247_s23, %s1243_s22 }
  0x18   : > { %1789 = sst [smem:[#allocation21_spill]] %s1259_s26  ;;  %s1856_s6 = smov (%p35_p0, %s34_s6), 0 }
  0x19   : > { %1790 = sst [smem:[#allocation22_spill]] %s1271_s29  ;;  %s1858_s7 = smov (!%p35_p0, %s37_s7), %s1267_s28 }
  0x1a   : > { %1791 = sst [smem:[#allocation23_spill]] %s1856_s6  ;;  %s46_s10 = ssub.s32 %s1263_s27, %s1856_s6 }
  0x1b   : > { %p58_p2 = scmp.eq.s32.totalorder %s1275_s30, 0  ;;  %p39_p3 = scmp.ge.s32.totalorder %s1858_s7, 3 }
  0x1c   : > { %p63_p4 = scmp.ne.s32.totalorder %s1243_s22, %s1239_s21  ;;  %p64_p6 = scmp.eq.s32.totalorder %s1404_s4, 0 }
  0x1d   : > { %p1422_p5 = por %p58_p2, %p57_p1  ;;  %s1860_s7 = smov (%p39_p3, %s1858_s7), 0 }
  0x1e   : > { %1793 = sst [smem:[#allocation24_spill]] %s1860_s7  ;;  %s1862_s8 = smov (!%p39_p3, %s41_s8), %s1271_s29 }
  0x1f   : > { %p1432_p7 = por %p64_p6, %p63_p4  ;;  %s73_s21 = ssub.s32 %s1267_s28, %s1860_s7 }
  0x20   : > { %p43_p8 = scmp.ge.s32.totalorder %s1862_s8, 3  ;;  %s75_s6 = sor.u32 %s73_s21, %s46_s10 }
  0x21   : > { %p76_p9 = scmp.eq.s32.totalorder %s75_s6, 0  ;;  %s78_s3 = sadd.s32 1, %s1235_s20 }
  0x22   : > { %s1864_s8 = smov (%p43_p8, %s1862_s8), 0  ;;  %p85_p10 = scmp.ne.s32.totalorder %s1235_s20, %s1231_s19 }
  0x23   : > { %1795 = sst [smem:[#allocation25_spill]] %s1864_s8  ;;  %s45_s26 = ssub.s32 %s1271_s29, %s1864_s8 }
  0x24   : > { %s1442_s25 = scalar_select %p76_p9, %s1235_s20, %s78_s3  }
  0x25   : > { %s47_s7 = sor.u32 %s46_s10, %s45_s26  ;;  %p91_p11 = scmp.ne.s32.totalorder %s1231_s19, %s1227_s18 }
  0x26   : > { %1796 = sst [smem:[#allocation26_spill]] %s1442_s25  ;;  %p48_p12 = scmp.eq.s32.totalorder %s47_s7, 0 }
  0x27   : > { %p1452_p13 = por %p85_p10, %p58_p2  ;;  %p1458_p0 = por %p91_p11, %p64_p6 }
  0x28   : > { %p102_p1 = scmp.eq.s32.totalorder %s73_s21, 0  ;;  %s104_s18 = sadd.s32 1, %s1223_s17 }
  0x29   : > { %s1798_s3 = scalar_select %p1458_p0, 1, 0 }
  0x2a   : > { %s1463_s10 = scalar_select %p48_p12, %s1247_s23, %s50_s9  }
  0x2b   : > { %1799 = sst [smem:[#allocation27_spill]] %s1798_s3  ;;  %p111_p3 = scmp.ne.s32.totalorder %s1223_s17, %s1219_s16 }
  0x2c   : > { %1800 = sst [smem:[#allocation28_spill]] %s1463_s10  ;;  %p117_p8 = scmp.ne.s32.totalorder %s1219_s16, %s1215_s15 }
  0x2d   : > { %s1469_s7 = scalar_select %p102_p1, %s1223_s17, %s104_s18  }
  0x2e   : > { %p1473_p4 = por %p111_p3, %p58_p2  ;;  %s129_s25 = sor.u32 %s73_s21, %s45_s26 }
  0x2f   : > { %1801 = sst [smem:[#allocation29_spill]] %s1469_s7  ;;  %s132_s24 = sadd.s32 1, %s1211_s14 }
  0x30   : > { %p1482_p9 = por %p117_p8, %p64_p6  ;;  %p130_p10 = scmp.eq.s32.totalorder %s129_s25, 0 }
  0x31   : > { %p142_p11 = scmp.ne.s32.totalorder %s1211_s14, %s1207_s13  ;;  %p143_p12 = scmp.eq.s32.totalorder %s1404_s4, 35 }
  0x32   : > { %s1803_s3 = scalar_select %p1482_p9, 1, 0 }
  0x33   : > { %s1490_s9 = scalar_select %p130_p10, %s1211_s14, %s132_s24  }
  0x34   : > { %1804 = sst [smem:[#allocation30_spill]] %s1803_s3  ;;  %p1492_p1 = por %p143_p12, %p142_p11 }
  0x35   : > { %1805 = sst [smem:[#allocation31_spill]] %s1490_s9  ;;  %p148_p2 = scmp.ne.s32.totalorder %s1207_s13, %s1203_s12 }
  0x36   : > { %s1806_s18 = scalar_select %p1492_p1, 1, 0 }
  0x37   : > { %s1808_s10 = sadd.s32 4294967294, %s1275_s30   ;;  %p707_p6 = scmp.ge.s32.totalorder %s1275_s30, 36 }
  0x38   : > { %1807 = sst [smem:[#allocation32_spill]] %s1806_s18  ;;  %p149_p3 = scmp.eq.s32.totalorder %s1808_s10, 35 }
  0x3a   : > { %p1500_p0 = por %p149_p3, %p148_p2  ;;  %165 = sbr.rel (%p707_p6) target bundleno = 122 (0x7a), region = 16 }
  0x3c   : > { %s1809_s15 = scalar_select %p1500_p0, 1, 0 }
  0x3e   : > { %1810 = sst [smem:[#allocation33_spill]] %s1809_s15 }
  0x3f   : > { %168 = sbr.rel (!%p1422_p5) target bundleno = 90 (0x5a), region = 20  ;;  %s169_s24 = sand.u32 (%p1422_p5), 1, %s1247_s23  }
  0x40   : > { %s709_s25 = sshll.u32 (%p1422_p5), %s1271_s29, 4  ;;  %s708_s26 = sshll.u32 (%p1422_p5), %s169_s24, 7 }
  0x41   : > { %s175_s21 = ssub.s32 (%p1422_p5), 40, %s709_s25  ;;  %s1512_s14 = scalar_lea.sflag (%p1422_p5), [#allocation4], %s169_s24 }
  0x42   : > { %p176_p8 = scmp.lt.s32.totalorder (%p1422_p5), %s175_s21, 16  ;;  %s173_s15 = scalar_lea.vmem (%p1422_p5), [#allocation3], %s708_s26 }
  0x44   : > { %s1866_s21 = smov (!%p176_p8, %s175_s21), 16 }
  0x45   : > { %s710_s10 = sshll.u32 %s1866_s21, 3 }
  0x46   : > { %s179_s7 = ssub.s32 128, %s710_s10 }
  0x47   : > { %s180_s9 = sshll.u32 %s179_s7, 4 }
  0x48   : > { %181 = vsyncadd %s1512_s14, %s180_s9  ;;  %p1515_p5 = scmp.ne.s32.totalorder %s710_s10, 0  ;;  %s740_s25 = sshll.u32 %s1271_s29, 6 }
  0x49   : > { %s184_s23 = sadd.s32 %s1263_s27, %s740_s25  ;;  %s190_s12 = sshll.u32 %s173_s15, 4  ;;  %s191_s12 = int_to_ptr.vmem [resolvable:$true] %s190_s12 }
  0x4a   : > { %s713_s18 = sshll.u32 %s184_s23, 3  ;;  %s715_s3 = sshll.u32 %s1866_s21, 7 }
  0x4b   : > { %s186_s24 = scalar_lea.hbm %s1758_s0, %s713_s18  ;;  %s966_s9 = sshrl.u32 %s715_s3, 4 }
  0x4c   : > { %s188_s26 = sshll.u32 %s186_s24, 4  ;;  %s983_s16 = sshra.s32 %s191_s12, 4  ;;  %s189_s26 = int_to_ptr.hbm [resolvable:$true] %s188_s26  ;;  %s984_s16 = int_to_ptr.vmem [resolvable:$true] %s983_s16 }
  0x4d   : > { %s990_s10 = scalar_lea.vmem %s984_s16, %s966_s9  ;;  %s1277_s29 = smov [#allocation3]  }
  0x4e   : > { %p991_p10 = scmp.ne.s32.totalorder %s984_s16, %s990_s10  ;;  %s994_s25 = scalar_lea.vmem %s1277_s29, 256 }
  0x4f   : > { %p996_p2 = scmp.lt.s32.totalorder %s994_s25, %s990_s10 }
  0x50   : > { %p992_p11 = pnand %p991_p10, %p1515_p5 }
  0x52   : > { %p993_p12 = pneg %p992_p11 }
  0x54   : > { %p998_p3 = pnand %p996_p2, %p993_p12 }
  0x56   : > { %1001 = shalt.err (!%p998_p3)
}
  0x57   : > { %s1278_s23 = smov 512   ;;  %s1279_s13 = smov 128  }
  0x58   : > { %s1280_s18 = smov 8  }
  0x59   : > { %196 = dma.hbm_to_vmem [thread:$0]  (%p1515_p5), %s189_s26, %s715_s3, %s191_s12, %s1512_s14, %s1278_s23, %s1279_s13, %s1280_s18  }
  0x5a PF: > { %199 = sbr.rel (!%p1452_p13) target bundleno = 117 (0x75), region = 24  ;;  %s200_s16 = sand.u32 (%p1452_p13), 1, %s1275_s30  }
  0x5b   : > { %s202_s15 = sand.u32 (%p1452_p13), 1, %s1235_s20   ;;  %s717_s21 = sshll.u32 (%p1452_p13), %s1267_s28, 4 }
  0x5c   : > { %s716_s29 = sshll.u32 (%p1452_p13), %s202_s15, 7  ;;  %s206_s7 = ssub.s32 (%p1452_p13), 40, %s717_s21 }
  0x5d   : > { %p207_p6 = scmp.lt.s32.totalorder (%p1452_p13), %s206_s7, 16  ;;  %s1538_s12 = scalar_lea.sflag (%p1452_p13), [#allocation7], %s200_s16 }
  0x5e   : > { %s204_s14 = scalar_lea.vmem (%p1452_p13), [#allocation6], %s716_s29 }
  0x5f   : > { %s1868_s7 = smov (!%p207_p6, %s206_s7), 16 }
  0x60   : > { %s718_s24 = sshll.u32 %s1868_s7, 3 }
  0x61   : > { %s210_s9 = ssub.s32 128, %s718_s24 }
  0x62   : > { %s211_s11 = sshll.u32 %s210_s9, 4 }
  0x63   : > { %212 = vsyncadd %s1538_s12, %s211_s11  ;;  %p1541_p13 = scmp.ne.s32.totalorder %s718_s24, 0  ;;  %s741_s3 = sshll.u32 %s1267_s28, 6 }
  0x64   : > { %s215_s26 = sadd.s32 %s1263_s27, %s741_s3  ;;  %s221_s10 = sshll.u32 %s204_s14, 4  ;;  %s222_s10 = int_to_ptr.vmem [resolvable:$true] %s221_s10 }
  0x65   : > { %s721_s25 = sshll.u32 %s215_s26, 3  ;;  %s723_s16 = sshll.u32 %s1868_s7, 7 }
  0x66   : > { %s217_s18 = scalar_lea.hbm %s1759_s1, %s721_s25  ;;  %s1005_s29 = sshrl.u32 %s723_s16, 4 }
  0x67   : > { %s219_s15 = sshll.u32 %s217_s18, 4  ;;  %s1022_s21 = sshra.s32 %s222_s10, 4  ;;  %s220_s15 = int_to_ptr.hbm [resolvable:$true] %s219_s15  ;;  %s1023_s21 = int_to_ptr.vmem [resolvable:$true] %s1022_s21 }
  0x68   : > { %s1029_s24 = scalar_lea.vmem %s1023_s21, %s1005_s29  ;;  %s1281_s9 = smov [#allocation6]  }
  0x69   : > { %p1030_p8 = scmp.ne.s32.totalorder %s1023_s21, %s1029_s24  ;;  %s1033_s11 = scalar_lea.vmem %s1281_s9, 256 }
  0x6a   : > { %p1035_p11 = scmp.lt.s32.totalorder %s1033_s11, %s1029_s24 }
  0x6b   : > { %p1031_p5 = pnand %p1030_p8, %p1541_p13 }
  0x6d   : > { %p1032_p10 = pneg %p1031_p5 }
  0x6f   : > { %p1037_p12 = pnand %p1035_p11, %p1032_p10 }
  0x71   : > { %1040 = shalt.err (!%p1037_p12)
}
  0x72   : > { %s1282_s14 = smov 512   ;;  %s1283_s3 = smov 128  }
  0x73   : > { %s1284_s7 = smov 8  }
  0x74   : > { %227 = dma.hbm_to_vmem [thread:$0]  (%p1541_p13), %s220_s15, %s723_s16, %s222_s10, %s1538_s12, %s1282_s14, %s1283_s3, %s1284_s7  }
  0x75 PF: > { %s231_s26 = sand.u32 1, %s1275_s30   ;;  %s233_s25 = sand.u32 1, %s1223_s17  }
  0x76   : > { %s237_s18 = scalar_lea.hbm %s1760_s2, %s1267_s28  ;;  %s234_s29 = scalar_lea.vmem [#allocation8], %s233_s25 }
  0x77   : > { %s241_s21 = sshll.u32 %s234_s29, 4  ;;  %s239_s24 = sshll.u32 %s237_s18, 4  ;;  %s242_s21 = int_to_ptr.vmem [resolvable:$true] %s241_s21  ;;  %s240_s24 = int_to_ptr.hbm [resolvable:$true] %s239_s24 }
  0x78   : > { %s232_s9 = scalar_lea.sflag [#allocation7], %s231_s26 }
  0x79   : > { %791 = dma.hbm_to_vmem [thread:$0]  (%p1473_p4), %s240_s24, 16, %s242_s21, %s232_s9  }
  0x7a PF: > { %p724_p2 = scmp.ge.s32.totalorder %s1275_s30, 1  ;;  %p246_p3 = scmp.lt.s32.totalorder %s1275_s30, 37 }
  0x7c   : > { %p247_p6 = pnand %p724_p2, %p246_p3 }
  0x7d   : > { %s252_s12 = sand.u32 (!%p247_p6), 1, %s1243_s22  }
  0x7e   : > { %250 = sbr.rel (%p247_p6) target bundleno = 467 (0x1d3), region = 32  ;;  %s725_s6 = sshll.u32 (!%p247_p6), %s252_s12, 7 }
  0x7f   : > { %s253_s10 = scalar_lea.sflag (!%p247_p6), [#allocation4], %s252_s12  ;;  %s1567_s16 = scalar_lea.vmem (!%p247_p6), [#allocation3], %s725_s6 }
  0x83   : > { %1186 = dma.done.wait (%p1432_p7), %s253_s10, 2048  }
  0x84   : > { %1188 = vsyncadd (%p1432_p7), %s253_s10, 4294965248  ;;  %s1813_s8 = sld [smem:[#allocation27_spill]]  ;;  %s262_s15 = sand.u32 1, %s1404_s4  }
  0x85   : > { %s264_s11 = sand.u32 1, %s1231_s19   ;;  %s263_s3 = scalar_lea.sflag [#allocation7], %s262_s15 }
  0x86   : > { %s726_s14 = sshll.u32 %s264_s11, 7 }
  0x87   : > { %s1575_s7 = scalar_lea.vmem [#allocation6], %s726_s14 }
  0x8a   : > { %p1814_p4 = scmp.ne.s32.totalorder %s1813_s8, 0 }
  0x8c   : > { %1190 = dma.done.wait (%p1814_p4), %s263_s3, 2048  }
  0x8d   : > { %1192 = vsyncadd (%p1814_p4), %s263_s3, 4294965248  ;;  %s1815_s26 = sld [smem:[#allocation17_spill]] }
  0x93   : > { %s274_s23 = sand.u32 1, %s1815_s26  }
  0x94   : > { %s1582_s13 = scalar_lea.vmem [#allocation8], %s274_s23 }
  0x95   : > { %1194 = dma.done.wait (%p1482_p9), %s263_s3, 16  }
  0x96   : > { %1196 = vsyncadd (%p1482_p9), %s263_s3, 4294967280  ;;  %s1817_s4 = sld [smem:[#allocation15_spill]] }
  0x97   : > { %s1818_s21 = sld [smem:[#allocation19_spill]] }
  0x9c   : > { %s305_s5 = sand.u32 1, %s1817_s4  }
  0x9d   : > { %s727_s18 = sshll.u32 %s305_s5, 7  ;;  %p728_p7 = scmp.ne.s32.totalorder %s1818_s21, 0 }
  0x9e   : > { %s1591_s29 = scalar_lea.vmem [#allocation9], %s727_s18 }
  0x9f   : > { %326 = sbr.rel (%p728_p7) target bundleno = 181 (0xb5), region = 48 }
  0xa4   : > { %v1285_v0 = vmov 0.0  }
  0xa5   : > { %327 = vst [vmem:[#allocation2 + $0x30] sm:$0xff] %v1285_v0 }
  0xa6   : > { %328 = vst [vmem:[#allocation2] sm:$0xff] %v1285_v0 }
  0xa7   : > { %329 = vst [vmem:[#allocation2 + $0x58] sm:$0xff] %v1285_v0 }
  0xa8   : > { %330 = vst [vmem:[#allocation2 + $0x18] sm:$0xff] %v1285_v0 }
  0xa9   : > { %331 = vst [vmem:[#allocation2 + $0x50] sm:$0xff] %v1285_v0 }
  0xaa   : > { %332 = vst [vmem:[#allocation2 + $0x68] sm:$0xff] %v1285_v0 }
  0xab   : > { %333 = vst [vmem:[#allocation2 + $0x8] sm:$0xff] %v1285_v0 }
  0xac   : > { %334 = vst [vmem:[#allocation2 + $0x48] sm:$0xff] %v1285_v0 }
  0xad   : > { %335 = vst [vmem:[#allocation2 + $0x40] sm:$0xff] %v1285_v0 }
  0xae   : > { %336 = vst [vmem:[#allocation2 + $0x20] sm:$0xff] %v1285_v0 }
  0xaf   : > { %337 = vst [vmem:[#allocation2 + $0x10] sm:$0xff] %v1285_v0 }
  0xb0   : > { %338 = vst [vmem:[#allocation2 + $0x38] sm:$0xff] %v1285_v0 }
  0xb1   : > { %339 = vst [vmem:[#allocation2 + $0x60] sm:$0xff] %v1285_v0 }
  0xb2   : > { %340 = vst [vmem:[#allocation2 + $0x70] sm:$0xff] %v1285_v0 }
  0xb3   : > { %341 = vst [vmem:[#allocation2 + $0x78] sm:$0xff] %v1285_v0 }
  0xb4   : > { %342 = vst [vmem:[#allocation2 + $0x28] sm:$0xff] %v1285_v0 }
  0xb5 PF: > { %v390_v1 = vld [vmem:[%s1575_s7 + $0x78] sm:$0xff]  ;;  %v389_v2 = vld [vmem:[%s1575_s7 + $0x70] sm:$0xff]  ;;  %v388_v3 = vld [vmem:[%s1575_s7 + $0x68] sm:$0xff]  ;;  %s1819_s24 = sld [smem:[#allocation19_spill]] }
  0xb6   : > { %743 = vmatpush.xpose.msra.mxu2 %v390_v1  ;;  %744 = vmatpush.xpose.msra.mxu3 %v390_v1  ;;  %v387_v4 = vld [vmem:[%s1575_s7 + $0x60] sm:$0xff]  ;;  %v386_v5 = vld [vmem:[%s1575_s7 + $0x58] sm:$0xff]  ;;  %v385_v6 = vld [vmem:[%s1575_s7 + $0x50] sm:$0xff] }
  0xb7   : > { %391 = vmatpush.xpose.msra.mxu0 %v390_v1  ;;  %742 = vmatpush.xpose.msra.mxu1 %v390_v1  ;;  %v384_v7 = vld [vmem:[%s1575_s7 + $0x48] sm:$0xff]  ;;  %v383_v8 = vld [vmem:[%s1575_s7 + $0x40] sm:$0xff]  ;;  %v382_v9 = vld [vmem:[%s1575_s7 + $0x38] sm:$0xff] }
  0xb8   : > { %v381_v10 = vld [vmem:[%s1575_s7 + $0x30] sm:$0xff]  ;;  %v380_v11 = vld [vmem:[%s1575_s7 + $0x28] sm:$0xff]  ;;  %v379_v12 = vld [vmem:[%s1575_s7 + $0x20] sm:$0xff] }
  0xb9   : > { %v378_v13 = vld [vmem:[%s1575_s7 + $0x18] sm:$0xff]  ;;  %v377_v14 = vld [vmem:[%s1575_s7 + $0x10] sm:$0xff]  ;;  %v376_v15 = vld [vmem:[%s1575_s7 + $0x8] sm:$0xff] }
  0xba   : > { %746 = vmatpush.xpose.msra.mxu2 %v389_v2  ;;  %747 = vmatpush.xpose.msra.mxu3 %v389_v2  ;;  %v375_v16 = vld [vmem:[%s1575_s7] sm:$0xff]  ;;  %v368_v21 = vld [vmem:[%s1567_s16 + $0x48] sm:$0xff]  ;;  %v369_v25 = vld [vmem:[%s1567_s16 + $0x50] sm:$0xff] }
  0xbb   : > { %392 = vmatpush.xpose.msra.mxu0 %v389_v2  ;;  %745 = vmatpush.xpose.msra.mxu1 %v389_v2  ;;  %v367_v17 = vld [vmem:[%s1567_s16 + $0x40] sm:$0xff]  ;;  %v372_v22 = vld [vmem:[%s1567_s16 + $0x68] sm:$0xff]  ;;  %v373_v26 = vld [vmem:[%s1567_s16 + $0x70] sm:$0xff]  ;;  %p729_p9 = scmp.ne.s32.totalorder %s1819_s24, 3 }
  0xbc   : > { %v371_v18 = vld [vmem:[%s1567_s16 + $0x60] sm:$0xff]  ;;  %v360_v23 = vld [vmem:[%s1567_s16 + $0x8] sm:$0xff]  ;;  %v361_v27 = vld [vmem:[%s1567_s16 + $0x10] sm:$0xff] }
  0xbd   : > { %v359_v19 = vld [vmem:[%s1567_s16] sm:$0xff]  ;;  %v364_v24 = vld [vmem:[%s1567_s16 + $0x28] sm:$0xff]  ;;  %v365_v28 = vld [vmem:[%s1567_s16 + $0x30] sm:$0xff] }
  0xbe   : > { %749 = vmatpush.xpose.msra.mxu2 %v388_v3  ;;  %750 = vmatpush.xpose.msra.mxu3 %v388_v3  ;;  %v363_v20 = vld [vmem:[%s1567_s16 + $0x20] sm:$0xff]  ;;  %v370_v29 = vld [vmem:[%s1567_s16 + $0x58] sm:$0xff]  ;;  %v343_v33 = vld [vmem:[#allocation2 + $0x30] sm:$0xff] }
  0xbf   : > { %393 = vmatpush.xpose.msra.mxu0 %v388_v3  ;;  %748 = vmatpush.xpose.msra.mxu1 %v388_v3  ;;  %v374_v30 = vld [vmem:[%s1567_s16 + $0x78] sm:$0xff]  ;;  %v347_v34 = vld [vmem:[#allocation2 + $0x50] sm:$0xff]  ;;  %v351_v39 = vld [vmem:[#allocation2 + $0x40] sm:$0xff] }
  0xc0   : > { %v362_v31 = vld [vmem:[%s1567_s16 + $0x18] sm:$0xff]  ;;  %v355_v40 = vld [vmem:[#allocation2 + $0x60] sm:$0xff]  ;;  %v348_v46 = vld [vmem:[#allocation2 + $0x68] sm:$0xff] }
  0xc1   : > { %v366_v32 = vld [vmem:[%s1567_s16 + $0x38] sm:$0xff]  ;;  %v344_v45 = vld [vmem:[#allocation2] sm:$0xff]  ;;  %v356_v52 = vld [vmem:[#allocation2 + $0x70] sm:$0xff] }
  0xc2   : > { %752 = vmatpush.xpose.msra.mxu2 %v387_v4  ;;  %753 = vmatpush.xpose.msra.mxu3 %v387_v4  ;;  %v352_v51 = vld [vmem:[#allocation2 + $0x20] sm:$0xff]  ;;  %v345_v57 = vld [vmem:[#allocation2 + $0x58] sm:$0xff]  ;;  %v349_v58 = vld [vmem:[#allocation2 + $0x8] sm:$0xff] }
  0xc3   : > { %394 = vmatpush.xpose.msra.mxu0 %v387_v4  ;;  %751 = vmatpush.xpose.msra.mxu1 %v387_v4  ;;  %v353_v63 = vld [vmem:[#allocation2 + $0x10] sm:$0xff]  ;;  %v357_v0 = vld [vmem:[#allocation2 + $0x78] sm:$0xff] }
  0xc6   : > { %755 = vmatpush.xpose.msra.mxu2 %v386_v5  ;;  %756 = vmatpush.xpose.msra.mxu3 %v386_v5 }
  0xc7   : > { %395 = vmatpush.xpose.msra.mxu0 %v386_v5  ;;  %754 = vmatpush.xpose.msra.mxu1 %v386_v5  ;;  %v346_v5 = vld [vmem:[#allocation2 + $0x18] sm:$0xff] }
  0xca   : > { %758 = vmatpush.xpose.msra.mxu2 %v385_v6  ;;  %759 = vmatpush.xpose.msra.mxu3 %v385_v6 }
  0xcb   : > { %396 = vmatpush.xpose.msra.mxu0 %v385_v6  ;;  %757 = vmatpush.xpose.msra.mxu1 %v385_v6  ;;  %v350_v6 = vld [vmem:[#allocation2 + $0x48] sm:$0xff] }
  0xce   : > { %761 = vmatpush.xpose.msra.mxu2 %v384_v7  ;;  %762 = vmatpush.xpose.msra.mxu3 %v384_v7 }
  0xcf   : > { %397 = vmatpush.xpose.msra.mxu0 %v384_v7  ;;  %760 = vmatpush.xpose.msra.mxu1 %v384_v7 }
  0xd2   : > { %764 = vmatpush.xpose.msra.mxu2 %v383_v8  ;;  %765 = vmatpush.xpose.msra.mxu3 %v383_v8 }
  0xd3   : > { %398 = vmatpush.xpose.msra.mxu0 %v383_v8  ;;  %763 = vmatpush.xpose.msra.mxu1 %v383_v8 }
  0xd6   : > { %767 = vmatpush.xpose.msra.mxu2 %v382_v9  ;;  %768 = vmatpush.xpose.msra.mxu3 %v382_v9 }
  0xd7   : > { %399 = vmatpush.xpose.msra.mxu0 %v382_v9  ;;  %766 = vmatpush.xpose.msra.mxu1 %v382_v9 }
  0xda   : > { %770 = vmatpush.xpose.msra.mxu2 %v381_v10  ;;  %771 = vmatpush.xpose.msra.mxu3 %v381_v10 }
  0xdb   : > { %400 = vmatpush.xpose.msra.mxu0 %v381_v10  ;;  %769 = vmatpush.xpose.msra.mxu1 %v381_v10 }
  0xde   : > { %773 = vmatpush.xpose.msra.mxu2 %v380_v11  ;;  %774 = vmatpush.xpose.msra.mxu3 %v380_v11 }
  0xdf   : > { %401 = vmatpush.xpose.msra.mxu0 %v380_v11  ;;  %772 = vmatpush.xpose.msra.mxu1 %v380_v11  ;;  %v354_v11 = vld [vmem:[#allocation2 + $0x38] sm:$0xff] }
  0xe2   : > { %776 = vmatpush.xpose.msra.mxu2 %v379_v12  ;;  %777 = vmatpush.xpose.msra.mxu3 %v379_v12 }
  0xe3   : > { %402 = vmatpush.xpose.msra.mxu0 %v379_v12  ;;  %775 = vmatpush.xpose.msra.mxu1 %v379_v12  ;;  %v358_v12 = vld [vmem:[#allocation2 + $0x28] sm:$0xff] }
  0xe6   : > { %779 = vmatpush.xpose.msra.mxu2 %v378_v13  ;;  %780 = vmatpush.xpose.msra.mxu3 %v378_v13 }
  0xe7   : > { %403 = vmatpush.xpose.msra.mxu0 %v378_v13  ;;  %778 = vmatpush.xpose.msra.mxu1 %v378_v13 }
  0xea   : > { %782 = vmatpush.xpose.msra.mxu2 %v377_v14  ;;  %783 = vmatpush.xpose.msra.mxu3 %v377_v14 }
  0xeb   : > { %404 = vmatpush.xpose.msra.mxu0 %v377_v14  ;;  %781 = vmatpush.xpose.msra.mxu1 %v377_v14 }
  0xee   : > { %785 = vmatpush.xpose.msra.mxu2 %v376_v15  ;;  %786 = vmatpush.xpose.msra.mxu3 %v376_v15 }
  0xef   : > { %405 = vmatpush.xpose.msra.mxu0 %v376_v15  ;;  %784 = vmatpush.xpose.msra.mxu1 %v376_v15 }
  0xf2   : > { %788 = vmatpush.xpose.msra.mxu2 %v375_v16  ;;  %789 = vmatpush.xpose.msra.mxu3 %v375_v16 }
  0xf3   : > { %406 = vmatpush.xpose.msra.mxu0 %v375_v16  ;;  %787 = vmatpush.xpose.msra.mxu1 %v375_v16 }
  0xf5   : > { %431 = vmatmul.f32.vlgmr.msra.gmra.mxu2 %v367_v17  ;;  %443 = vmatmul.f32.vlgmr.msra.gmra.mxu3 %v371_v18 }
  0xf6   : > { %407 = vmatmul.f32.vlgmr.msra.gmra.mxu0 %v359_v19  ;;  %419 = vmatmul.f32.vlgmr.msra.gmra.mxu1 %v363_v20 }
  0xfd   : > { %434 = vmatmul.f32.gmra.mxu2 %v368_v21  ;;  %446 = vmatmul.f32.gmra.mxu3 %v372_v22 }
  0xfe   : > { %410 = vmatmul.f32.gmra.mxu0 %v360_v23  ;;  %422 = vmatmul.f32.gmra.mxu1 %v364_v24 }
 0x105   : > { %437 = vmatmul.f32.gmra.mxu2 %v369_v25  ;;  %449 = vmatmul.f32.gmra.mxu3 %v373_v26 }
 0x106   : > { %413 = vmatmul.f32.gmra.mxu0 %v361_v27  ;;  %425 = vmatmul.f32.gmra.mxu1 %v365_v28 }
 0x10d   : > { %440 = vmatmul.f32.gmra.mxu2 %v370_v29  ;;  %452 = vmatmul.f32.gmra.mxu3 %v374_v30 }
 0x10e   : > { %416 = vmatmul.f32.gmra.mxu0 %v362_v31  ;;  %428 = vmatmul.f32.gmra.mxu1 %v366_v32 }
 0x173   : > { %v408_v35 = vpop.f32.mrf.mxu0  ;;  %v420_v36 = vpop.f32.mrf.mxu1 }
 0x174   : > { %v456_v37 = vadd.f32 %v408_v35, %v343_v33  ;;  %v460_v38 = vadd.f32 %v420_v36, %v347_v34 }
 0x176   : > { %472 = vst [vmem:[#allocation2 + $0x30] sm:$0xff] %v456_v37 }
 0x177   : > { %476 = vst [vmem:[#allocation2 + $0x50] sm:$0xff] %v460_v38 }
 0x178   : > { %v432_v41 = vpop.f32.mrf.mxu2  ;;  %v444_v42 = vpop.f32.mrf.mxu3 }
 0x179   : > { %v464_v43 = vadd.f32 %v432_v41, %v351_v39  ;;  %v468_v44 = vadd.f32 %v444_v42, %v355_v40 }
 0x17b   : > { %480 = vst [vmem:[#allocation2 + $0x40] sm:$0xff] %v464_v43  ;;  %v411_v47 = vpop.f32.mrf.mxu0  ;;  %v423_v48 = vpop.f32.mrf.mxu1 }
 0x17c   : > { %484 = vst [vmem:[#allocation2 + $0x60] sm:$0xff] %v468_v44  ;;  %v457_v49 = vadd.f32 %v411_v47, %v344_v45  ;;  %v461_v50 = vadd.f32 %v423_v48, %v348_v46 }
 0x17e   : > { %473 = vst [vmem:[#allocation2] sm:$0xff] %v457_v49 }
 0x17f   : > { %477 = vst [vmem:[#allocation2 + $0x68] sm:$0xff] %v461_v50 }
 0x180   : > { %v435_v53 = vpop.f32.mrf.mxu2  ;;  %v447_v54 = vpop.f32.mrf.mxu3 }
 0x181   : > { %v465_v55 = vadd.f32 %v435_v53, %v352_v51  ;;  %v469_v56 = vadd.f32 %v447_v54, %v356_v52 }
 0x183   : > { %481 = vst [vmem:[#allocation2 + $0x20] sm:$0xff] %v465_v55  ;;  %v414_v59 = vpop.f32.mrf.mxu0  ;;  %v426_v60 = vpop.f32.mrf.mxu1 }
 0x184   : > { %485 = vst [vmem:[#allocation2 + $0x70] sm:$0xff] %v469_v56  ;;  %v458_v61 = vadd.f32 %v414_v59, %v345_v57  ;;  %v462_v62 = vadd.f32 %v426_v60, %v349_v58 }
 0x186   : > { %474 = vst [vmem:[#allocation2 + $0x58] sm:$0xff] %v458_v61 }
 0x187   : > { %478 = vst [vmem:[#allocation2 + $0x8] sm:$0xff] %v462_v62 }
 0x188   : > { %v438_v1 = vpop.f32.mrf.mxu2  ;;  %v450_v2 = vpop.f32.mrf.mxu3 }
 0x189   : > { %v466_v3 = vadd.f32 %v438_v1, %v353_v63  ;;  %v470_v4 = vadd.f32 %v450_v2, %v357_v0 }
 0x18b   : > { %482 = vst [vmem:[#allocation2 + $0x10] sm:$0xff] %v466_v3  ;;  %v417_v7 = vpop.f32.mrf.mxu0  ;;  %v429_v8 = vpop.f32.mrf.mxu1 }
 0x18c   : > { %486 = vst [vmem:[#allocation2 + $0x78] sm:$0xff] %v470_v4  ;;  %v459_v9 = vadd.f32 %v417_v7, %v346_v5  ;;  %v463_v10 = vadd.f32 %v429_v8, %v350_v6 }
 0x18e   : > { %475 = vst [vmem:[#allocation2 + $0x18] sm:$0xff] %v459_v9 }
 0x18f   : > { %479 = vst [vmem:[#allocation2 + $0x48] sm:$0xff] %v463_v10 }
 0x190   : > { %v441_v13 = vpop.f32.mrf.mxu2  ;;  %v453_v14 = vpop.f32.mrf.mxu3  ;;  %491 = sbr.rel (%p729_p9) target bundleno = 424 (0x1a8), region = 52 }
 0x191   : > { %v467_v15 = vadd.f32 %v441_v13, %v354_v11  ;;  %v471_v16 = vadd.f32 %v453_v14, %v358_v12 }
 0x193   : > { %483 = vst [vmem:[#allocation2 + $0x38] sm:$0xff] %v467_v15 }
 0x194   : > { %487 = vst [vmem:[#allocation2 + $0x28] sm:$0xff] %v471_v16 }
 0x195   : > { %v492_v17 = vld [vmem:[#allocation2 + $0x30] sm:$0xff]  ;;  %v963_v18 = vld [vmem:[%s1582_s13] ss:$0 sm:$0xff]  ;;  %v494_v20 = vld [vmem:[#allocation2 + $0x58] sm:$0xff] }
 0x196   : > { %v493_v19 = vld [vmem:[#allocation2] sm:$0xff]  ;;  %v495_v21 = vld [vmem:[#allocation2 + $0x18] sm:$0xff]  ;;  %v512_v22 = vadd.f32 %v963_v18, %v492_v17  ;;  %v514_v24 = vadd.f32 %v963_v18, %v494_v20  ;;  %v496_v25 = vld [vmem:[#allocation2 + $0x50] sm:$0xff] }
 0x197   : > { %v513_v23 = vadd.f32 %v963_v18, %v493_v19  ;;  %v497_v26 = vld [vmem:[#allocation2 + $0x68] sm:$0xff]  ;;  %v515_v27 = vadd.f32 %v963_v18, %v495_v21  ;;  %v516_v29 = vadd.f32 %v963_v18, %v496_v25  ;;  %v500_v32 = vld [vmem:[#allocation2 + $0x40] sm:$0xff]  ;;  %v502_v36 = vld [vmem:[#allocation2 + $0x10] sm:$0xff] }
 0x198   : > { %v498_v28 = vld [vmem:[#allocation2 + $0x8] sm:$0xff]  ;;  %528 = vst [vmem:[%s1591_s29] sm:$0xff] %v512_v22  ;;  %v517_v31 = vadd.f32 %v963_v18, %v497_v26  ;;  %v501_v34 = vld [vmem:[#allocation2 + $0x20] sm:$0xff]  ;;  %v520_v37 = vadd.f32 %v963_v18, %v500_v32  ;;  %v522_v41 = vadd.f32 %v963_v18, %v502_v36  ;;  %v505_v42 = vld [vmem:[#allocation2 + $0x70] sm:$0xff] }
 0x199   : > { %v499_v30 = vld [vmem:[#allocation2 + $0x48] sm:$0xff]  ;;  %529 = vst [vmem:[%s1591_s29 + $0x8] sm:$0xff] %v513_v23  ;;  %v518_v33 = vadd.f32 %v963_v18, %v498_v28  ;;  %v521_v39 = vadd.f32 %v963_v18, %v501_v34  ;;  %v504_v40 = vld [vmem:[#allocation2 + $0x60] sm:$0xff]  ;;  %v506_v44 = vld [vmem:[#allocation2 + $0x78] sm:$0xff]  ;;  %v525_v47 = vadd.f32 %v963_v18, %v505_v42 }
 0x19a   : > { %530 = vst [vmem:[%s1591_s29 + $0x10] sm:$0xff] %v514_v24  ;;  %v519_v35 = vadd.f32 %v963_v18, %v499_v30  ;;  %v503_v38 = vld [vmem:[#allocation2 + $0x38] sm:$0xff]  ;;  %v524_v45 = vadd.f32 %v963_v18, %v504_v40  ;;  %v526_v48 = vadd.f32 %v963_v18, %v506_v44 }
 0x19b   : > { %531 = vst [vmem:[%s1591_s29 + $0x18] sm:$0xff] %v515_v27  ;;  %v523_v43 = vadd.f32 %v963_v18, %v503_v38  ;;  %v507_v46 = vld [vmem:[#allocation2 + $0x28] sm:$0xff] }
 0x19c   : > { %532 = vst [vmem:[%s1591_s29 + $0x20] sm:$0xff] %v516_v29  ;;  %v527_v49 = vadd.f32 %v963_v18, %v507_v46 }
 0x19d   : > { %533 = vst [vmem:[%s1591_s29 + $0x28] sm:$0xff] %v517_v31 }
 0x19e   : > { %534 = vst [vmem:[%s1591_s29 + $0x30] sm:$0xff] %v518_v33 }
 0x19f   : > { %535 = vst [vmem:[%s1591_s29 + $0x38] sm:$0xff] %v519_v35 }
 0x1a0   : > { %536 = vst [vmem:[%s1591_s29 + $0x40] sm:$0xff] %v520_v37 }
 0x1a1   : > { %537 = vst [vmem:[%s1591_s29 + $0x48] sm:$0xff] %v521_v39 }
 0x1a2   : > { %538 = vst [vmem:[%s1591_s29 + $0x50] sm:$0xff] %v522_v41 }
 0x1a3   : > { %539 = vst [vmem:[%s1591_s29 + $0x58] sm:$0xff] %v523_v43 }
 0x1a4   : > { %540 = vst [vmem:[%s1591_s29 + $0x60] sm:$0xff] %v524_v45 }
 0x1a5   : > { %541 = vst [vmem:[%s1591_s29 + $0x68] sm:$0xff] %v525_v47 }
 0x1a6   : > { %542 = vst [vmem:[%s1591_s29 + $0x70] sm:$0xff] %v526_v48 }
 0x1a7   : > { %543 = vst [vmem:[%s1591_s29 + $0x78] sm:$0xff] %v527_v49 }
 0x1a8 PF: > { %s1646_s12 = scalar_lea.sflag [#allocation5], %s305_s5  ;;  %551 = sbr.rel (!%p1492_p1) target bundleno = 467 (0x1d3), region = 56 }
 0x1a9   : > { %s1822_s10 = sld [smem:[#allocation21_spill]] (%p1492_p1) }
 0x1af   : > { %s731_s16 = sshll.u32 %s1822_s10, 4 }
 0x1b0   : > { %s553_s8 = ssub.s32 40, %s731_s16 }
 0x1b1   : > { %p554_p13 = scmp.lt.s32.totalorder %s553_s8, 16 }
 0x1b3   : > { %s1870_s8 = smov (!%p554_p13, %s553_s8), 16 }
 0x1b4   : > { %s732_s15 = sshll.u32 %s1870_s8, 3 }
 0x1b5   : > { %s557_s11 = ssub.s32 128, %s732_s15 }
 0x1b6   : > { %s558_s14 = sshll.u32 %s557_s11, 4 }
 0x1b7   : > { %559 = vsyncadd %s1646_s12, %s558_s14  ;;  %s1823_s3 = sld [smem:[#allocation20_spill]]  ;;  %p1655_p8 = scmp.ne.s32.totalorder %s732_s15, 0 }
 0x1b8   : > { %s790_s26 = smul.u32 48, %s1822_s10  ;;  %s566_s25 = sshll.u32 %s1591_s29, 4  ;;  %s1663_s25 = int_to_ptr.vmem [resolvable:$true] %s566_s25 }
 0x1b9   : > { %s737_s23 = sshll.u32 %s1870_s8, 7  ;;  %s1825_s21 = sld [smem:[#allocation34_spill]] }
 0x1ba   : > { %s1070_s16 = sshra.s32 %s1663_s25, 4  ;;  %s1072_s15 = sshrl.u32 %s737_s23, 4  ;;  %s1071_s16 = int_to_ptr.vmem [resolvable:$true] %s1070_s16 }
 0x1bb   : > { %s1077_s11 = scalar_lea.vmem %s1071_s16, %s1072_s15  ;;  %s1286_s29 = smov [#allocation9]  }
 0x1bc   : > { %p1078_p1 = scmp.ne.s32.totalorder %s1071_s16, %s1077_s11  ;;  %s1081_s10 = scalar_lea.vmem %s1286_s29, 256 }
 0x1bd   : > { %s562_s13 = sadd.s32 %s1823_s3, %s790_s26  ;;  %p1083_p11 = scmp.lt.s32.totalorder %s1081_s10, %s1077_s11 }
 0x1be   : > { %s735_s4 = sshll.u32 %s562_s13, 3  ;;  %p1079_p5 = pnand %p1078_p1, %p1655_p8 }
 0x1bf   : > { %s1826_s9 = smov %s1825_s21  ;;  %s564_s24 = scalar_lea.hbm %s1825_s21, %s735_s4 }
 0x1c0   : > { %s568_s6 = sshll.u32 %s564_s24, 4  ;;  %p1080_p10 = pneg %p1079_p5  ;;  %s1668_s6 = int_to_ptr.hbm [resolvable:$true] %s568_s6 }
 0x1c2   : > { %p1085_p12 = pnand %p1083_p11, %p1080_p10 }
 0x1c4   : > { %1088 = shalt.err (!%p1085_p12)
}
 0x1c5   : > { %s1089_s14 = sshra.s32 %s1668_s6, 4  ;;  %s1100_s4 = scalar_lea.hbm %s1826_s9, 960  ;;  %s1090_s14 = int_to_ptr.hbm [resolvable:$true] %s1089_s14 }
 0x1c6   : > { %s1096_s3 = scalar_lea.hbm %s1090_s14, %s1072_s15  ;;  %p1101_p4 = scmp.lt.s32.totalorder %s1090_s14, %s1826_s9 }
 0x1c7   : > { %p1097_p2 = scmp.ne.s32.totalorder %s1090_s14, %s1096_s3  ;;  %p1102_p7 = scmp.lt.s32.totalorder %s1100_s4, %s1096_s3 }
 0x1c9   : > { %p1098_p3 = pnand %p1097_p2, %p1655_p8  ;;  %p1103_p9 = por %p1102_p7, %p1101_p4 }
 0x1cb   : > { %p1099_p6 = pneg %p1098_p3 }
 0x1cd   : > { %p1104_p13 = pnand %p1103_p9, %p1099_p6 }
 0x1cf   : > { %1107 = shalt.err (!%p1104_p13)
}
 0x1d0   : > { %s1287_s21 = smov 128   ;;  %s1288_s24 = smov 384  }
 0x1d1   : > { %s1289_s16 = smov 8  }
 0x1d2   : > { %574 = dma.vmem_to_hbm [thread:$0]  (%p1655_p8), %s1663_s25, %s737_s23, %s1668_s6, %s1646_s12, %s1287_s21, %s1288_s24, %s1289_s16  }
 0x1d3 PF: > { %s1827_s15 = sld [smem:[#allocation14_spill]]  ;;  %p800_p1 = scmp.ge.s32.totalorder %s1275_s30, 2 }
 0x1d5   : > { %p797_p5 = pnand %p800_p1, %p1500_p0 }
 0x1d7   : > { %p798_p10 = pneg %p797_p5 }
 0x1d9   : > { %s583_s29 = sand.u32 1, %s1827_s15  }
 0x1da   : > { %s584_s10 = scalar_lea.sflag [#allocation5], %s583_s29 }
 0x1db   : > { %1198 = dma.done.wait (%p798_p10), %s584_s10, 2048  }
 0x1dc   : > { %1200 = vsyncadd (%p798_p10), %s584_s10, 4294965248  ;;  %s22_s30 = sadd.s32 1, %s1275_s30   ;;  %s1831_s12 = sld [smem:[#allocation15_spill]] }
 0x1dd   : > { %p1696_p11 = scmp.ge.s32.totalorder %s22_s30, 38   ;;  %s1832_s13 = sld [smem:[#allocation16_spill]] }
 0x1de   : > { %s1833_s14 = sld [smem:[#allocation31_spill]]  ;;  %s1843_s16 = smov %s1223_s17 }
 0x1df   : > { %s1834_s15 = sld [smem:[#allocation17_spill]]  ;;  %s1845_s18 = smov %s1231_s19 }
 0x1e0   : > { %s1835_s8 = sld [smem:[#allocation29_spill]]  ;;  %s1846_s19 = smov %s1235_s20 }
 0x1e1   : > { %s1836_s25 = sld [smem:[#allocation26_spill]]  ;;  %s1848_s21 = smov %s1243_s22 }
 0x1e2   : > { %s1837_s23 = sld [smem:[#allocation18_spill]]  ;;  %s1851_s24 = smov %s1263_s27 }
 0x1e3   : > { %s1838_s6 = sld [smem:[#allocation28_spill]] }
 0x1e4   : > { %s1839_s26 = sld [smem:[#allocation22_spill]] }
 0x1e5   : > { %s1840_s3 = sld [smem:[#allocation23_spill]] }
 0x1e6   : > { %s1841_s4 = sld [smem:[#allocation24_spill]]  ;;  %s1844_s17 = smov %s1835_s8 }
 0x1e7   : > { %s1842_s29 = sld [smem:[#allocation25_spill]]  ;;  %s1847_s20 = smov %s1836_s25 }
 0x1e8   : > { %s1849_s22 = smov %s1837_s23  ;;  %s1852_s25 = smov %s1267_s28 }
 0x1e9   : > { %s1850_s23 = smov %s1838_s6  ;;  %21 = sbr.rel (!%p1696_p11) target bundleno = 17 (0x11), region = 109 }
 0x1eb   : > { %s1853_s27 = smov %s1840_s3 }
 0x1ec   : > { %s1854_s28 = smov %s1841_s4 }
 0x1ee   :  { %590 = vsyncpa [#allocation4], 1 }
 0x1ef   :  { %592 = vsyncpa [#allocation4 + $0x1], 1 }
 0x1f0   :  { %593 = vsyncpa [#allocation7], 1 }
 0x1f1   :  { %595 = vsyncpa [#allocation7 + $0x1], 1 }
 0x1f2   :  { %596 = vsyncpa [#allocation5], 1 }
 0x1f3   :  { %598 = vsyncpa [#allocation5 + $0x1], 1 }

</bundles_post_ra>
